<compile_context>
chip_gen: v7x
topology: tpu7x:2x2x1
jax: 0.10.0
libtpu: 0.0.40
codegen_flags: <defaults>
</compile_context>

<pallas_src>
import functools

import jax
import jax.numpy as jnp
import numpy as np
from jax.experimental import pallas as pl
from jax.experimental.pallas import tpu as pltpu


def _round_up(v, m):
    return ((v + m - 1) // m) * m


def _gsa_kernel(feat_ref, w1_ref, w2_ref, b2_ref, w3_ref, b3_ref,
                out_ref, acc_ref, *, points_per_batch, tile_points):
    # feat_ref: VMEM bf16[1, TP, F]      one tile of packed [x || pos || 1] for one batch
    # w1_ref:   VMEM bf16[F,  H1]        W1 with b1 folded in (last row)
    # w2_ref:   VMEM bf16[H1, H2]        b2_ref: f32[1, H2]
    # w3_ref:   VMEM bf16[H2, C]         b3_ref: f32[1, C]
    # out_ref:  VMEM f32[1, 1, C]        written only at the last point tile
    # acc_ref:  VMEM f32[8, C]           running per-batch max (sublane-blocked partial max)
    t = pl.program_id(1)
    num_t = pl.num_programs(1)

    f = feat_ref[0]                                                   # (TP, F) bf16

    # Layer 1: concat([x, pos]) @ W1 + b1 (bias folded via the constant-1 column), then ReLU.
    h = jnp.dot(f, w1_ref[...], preferred_element_type=jnp.float32)
    h = jnp.maximum(h, 0.0)

    # Layer 2: Linear + ReLU (bf16 MXU operands, f32 accumulation).
    h = jnp.dot(h.astype(jnp.bfloat16), w2_ref[...], preferred_element_type=jnp.float32)
    h = jnp.maximum(h + b2_ref[...], 0.0)

    # Layer 3: plain Linear (PyG MLP-style plain last layer).
    h = jnp.dot(h.astype(jnp.bfloat16), w3_ref[...], preferred_element_type=jnp.float32)
    h = h + b3_ref[...]                                               # (TP, C) f32

    # Mask rows past this batch's valid point count (partial last tile / OOB DMA rows) to -inf.
    valid = points_per_batch - t * tile_points
    row = jax.lax.broadcasted_iota(jnp.int32, (tile_points, 1), 0)
    h = jnp.where(row < valid, h, -jnp.inf)

    # Sublane-aligned partial max: (TP, C) -> (TP/8, 8, C); reducing the leading axis is pure
    # elementwise VPU maxes across vregs (no XLU work in the inner loop).
    part = jnp.max(h.reshape(tile_points // 8, 8, h.shape[-1]), axis=0)   # (8, C)

    @pl.when(t == 0)
    def _():
        acc_ref[...] = jnp.full(acc_ref.shape, -jnp.inf, dtype=acc_ref.dtype)

    acc_ref[...] = jnp.maximum(acc_ref[...], part)

    @pl.when(t == num_t - 1)
    def _():
        # Single 8 -> 1 cross-sublane reduce per batch, then the lane-dense output store.
        out_ref[0] = jnp.max(acc_ref[...], axis=0, keepdims=True)


def global_sa_module(x, pos, batch, params, *, input_dim, num_batches,
                     tile_points=None, validate_batch=False):
    """x: f32[N, Cx]; pos: f32[N, D]; batch: i32[N] (contiguous, equal-sized batches).

    Returns (out f32[B, C_out], new_pos f32[B, input_dim], new_batch i32[B]).
    """
    N, Cx = x.shape
    D = pos.shape[1]
    B = num_batches
    assert N % B == 0, "expects equal-sized contiguous batches"
    P = N // B

    if validate_batch:
        expected = jnp.repeat(jnp.arange(B, dtype=batch.dtype), P)
        assert bool(jnp.all(batch == expected)), \
            "batch must be sorted, contiguous, equal-sized (dense PointNet++ layout)"

    # Point-tile size: default = whole batch (T == 1) for typical PointNet++ sizes, capped so
    # VMEM stays comfortably inside even v5e's 16 MiB default scoped limit.
    if tile_points is None:
        tile_points = min(_round_up(P, 16), 2048)
    assert tile_points % 16 == 0, "tile_points must be a multiple of 16 (bf16 sublane packing)"
    T = pl.cdiv(P, tile_points)

    w1, b1 = params["w1"], params["b1"]
    w2, b2 = params["w2"], params["b2"]
    w3, b3 = params["w3"], params["b3"]
    H1, H2, C_out = w1.shape[1], w2.shape[1], w3.shape[1]
    F = Cx + D + 1

    # Pack [x || pos || 1] once (one DMA stream, bias folded into W1), cast to bf16 for MXU.
    feat = jnp.concatenate(
        [x, pos, jnp.ones((N, 1), dtype=x.dtype)], axis=1).astype(jnp.bfloat16)
    feat = feat.reshape(B, P, F)

    w1p = jnp.concatenate([w1, b1.reshape(1, H1)], axis=0).astype(jnp.bfloat16)   # (F, H1)
    w2b = w2.astype(jnp.bfloat16)
    w3b = w3.astype(jnp.bfloat16)
    b2r = b2.reshape(1, H2).astype(jnp.float32)
    b3r = b3.reshape(1, C_out).astype(jnp.float32)

    kernel = functools.partial(_gsa_kernel, points_per_batch=P, tile_points=tile_points)

    out3 = pl.pallas_call(
        kernel,
        out_shape=jax.ShapeDtypeStruct((B, 1, C_out), jnp.float32),
        grid_spec=pltpu.PrefetchScalarGridSpec(
            num_scalar_prefetch=0,
            grid=(B, T),
            in_specs=[
                pl.BlockSpec((1, tile_points, F), lambda b, t: (b, t, 0)),
                pl.BlockSpec((F, H1), lambda b, t: (0, 0)),
                pl.BlockSpec((H1, H2), lambda b, t: (0, 0)),
                pl.BlockSpec((1, H2), lambda b, t: (0, 0)),
                pl.BlockSpec((H2, C_out), lambda b, t: (0, 0)),
                pl.BlockSpec((1, C_out), lambda b, t: (0, 0)),
            ],
            out_specs=pl.BlockSpec((1, 1, C_out), lambda b, t: (b, 0, 0)),
            scratch_shapes=[pltpu.VMEM((8, C_out), jnp.float32)],
        ),
        compiler_params=pltpu.CompilerParams(
            dimension_semantics=("parallel", "arbitrary")),
    )(feat, w1p, w2b, b2r, w3b, b3r)

    out = out3[:, 0, :]                                          # (B, C_out)
    new_pos = jnp.zeros((B, input_dim), dtype=pos.dtype)         # pos.new_zeros((B, input_dim))
    new_batch = jnp.arange(B, dtype=jnp.int32)                   # torch.arange(B)
    return out, new_pos, new_batch


def global_sa_module_ref(x, pos, batch, params, *, input_dim, num_batches, bf16=False):
    """Pure-JAX reference mirroring the PyTorch forward. bf16=True mirrors the kernel numerics."""
    del batch
    feat = jnp.concatenate([x, pos], axis=1)
    if bf16:
        bf = jnp.bfloat16
        h = jnp.dot(feat.astype(bf), params["w1"].astype(bf),
                    preferred_element_type=jnp.float32)
        h = jnp.maximum(h + params["b1"].astype(bf).astype(jnp.float32), 0.0)
        h = jnp.dot(h.astype(bf), params["w2"].astype(bf),
                    preferred_element_type=jnp.float32)
        h = jnp.maximum(h + params["b2"], 0.0)
        h = jnp.dot(h.astype(bf), params["w3"].astype(bf),
                    preferred_element_type=jnp.float32) + params["b3"]
    else:
        h = jax.nn.relu(feat @ params["w1"] + params["b1"])
        h = jax.nn.relu(h @ params["w2"] + params["b2"])
        h = h @ params["w3"] + params["b3"]
    B = num_batches
    out = h.reshape(B, -1, h.shape[1]).max(axis=1)               # global_max_pool
    new_pos = jnp.zeros((B, input_dim), dtype=pos.dtype)
    new_batch = jnp.arange(B, dtype=jnp.int32)
    return out, new_pos, new_batch


if __name__ == "__main__":
    key = jax.random.PRNGKey(0)
    # Small demo config: 2 batches x 192 points, 16 feature channels + 3-D positions;
    # MLP 19 -> 128 -> 128 -> 128 (lane-dense 128-wide hidden/output dims).
    B, P, Cx, D = 2, 192, 16, 3
    H1, H2, C_out = 128, 128, 128
    N = B * P

    ks = jax.random.split(key, 8)
    x = jax.random.normal(ks[0], (N, Cx), dtype=jnp.float32)
    pos = jax.random.normal(ks[1], (N, D), dtype=jnp.float32)
    batch = jnp.repeat(jnp.arange(B, dtype=jnp.int32), P)

    def init_linear(kw, kb, fan_in, fan_out):
        bound = 1.0 / np.sqrt(fan_in)
        w = jax.random.uniform(kw, (fan_in, fan_out), jnp.float32, -bound, bound)
        b = jax.random.uniform(kb, (fan_out,), jnp.float32, -bound, bound)
        return w, b

    w1, b1 = init_linear(ks[2], ks[3], Cx + D, H1)
    w2, b2 = init_linear(ks[4], ks[5], H1, H2)
    w3, b3 = init_linear(ks[6], ks[7], H2, C_out)
    params = dict(w1=w1, b1=b1, w2=w2, b2=b2, w3=w3, b3=b3)

    ref_f32, ref_pos, ref_batch = global_sa_module_ref(
        x, pos, batch, params, input_dim=D, num_batches=B, bf16=False)
    ref_bf16, _, _ = global_sa_module_ref(
        x, pos, batch, params, input_dim=D, num_batches=B, bf16=True)

    # Run 1: default tiling (tile_points = P -> single grid step per batch).
    # Run 2: tile_points=128 -> T=2, exercises the partial-tile -inf mask and multi-step max.
    for tp in (None, 128):
        out, new_pos, new_batch = global_sa_module(
            x, pos, batch, params, input_dim=D, num_batches=B,
            tile_points=tp, validate_batch=True)
        out = jax.block_until_ready(out)

        assert out.shape == (B, C_out), out.shape
        # Tight check against a reference that mirrors the kernel's bf16-operand / f32-acc math.
        assert jnp.allclose(out, ref_bf16, atol=1e-2, rtol=1e-2), \
            f"mismatch vs bf16-mirror reference (tile_points={tp})"
        # Loose semantic check against the pure-f32 PyTorch-equivalent reference.
        assert jnp.allclose(out, ref_f32, atol=1e-1, rtol=1e-1), \
            f"mismatch vs f32 reference (tile_points={tp})"
        assert jnp.allclose(new_pos, ref_pos), "pos mismatch"
        assert bool(jnp.all(new_batch == ref_batch)), "batch mismatch"

    print("KERNEL_OK")
</pallas_src>

<mosaic_0001>
module attributes {stable_mosaic.version = 11 : i64} {
  func.func @_gsa_kernel(%arg0: i32, %arg1: i32, %arg2: memref<1x192x20xbf16, #tpu.memory_space<vmem>>, %arg3: memref<20x128xbf16, #tpu.memory_space<vmem>>, %arg4: memref<128x128xbf16, #tpu.memory_space<vmem>>, %arg5: memref<1x128xf32, #tpu.memory_space<vmem>>, %arg6: memref<128x128xbf16, #tpu.memory_space<vmem>>, %arg7: memref<1x128xf32, #tpu.memory_space<vmem>>, %arg8: memref<1x1x128xf32, #tpu.memory_space<vmem>>, %arg9: memref<8x128xf32, #tpu.memory_space<vmem>>) attributes {dimension_semantics = [#tpu.dimension_semantics<parallel>, #tpu.dimension_semantics<arbitrary>], iteration_bounds = array<i64: 2, 1>, scalar_prefetch = 0 : i64, scratch_operands = 1 : i64, tpu.core_type = #tpu.core_type<tc>, window_params = [{transform_indices = @transform_0, window_bounds = array<i64: 1, 192, 20>}, {pipeline_mode = #tpu.pipeline_mode<synchronous>, transform_indices = @transform_1, window_bounds = array<i64: 20, 128>}, {pipeline_mode = #tpu.pipeline_mode<synchronous>, transform_indices = @transform_2, window_bounds = array<i64: 128, 128>}, {pipeline_mode = #tpu.pipeline_mode<synchronous>, transform_indices = @transform_3, window_bounds = array<i64: 1, 128>}, {pipeline_mode = #tpu.pipeline_mode<synchronous>, transform_indices = @transform_4, window_bounds = array<i64: 128, 128>}, {pipeline_mode = #tpu.pipeline_mode<synchronous>, transform_indices = @transform_5, window_bounds = array<i64: 1, 128>}, {transform_indices = @transform_6, window_bounds = array<i64: 1, 1, 128>}]} {
    %c0 = arith.constant 0 : index
    %c0_0 = arith.constant 0 : index
    %c0_1 = arith.constant 0 : index
    %0 = vector.load %arg2[%c0, %c0_0, %c0_1] : memref<1x192x20xbf16, #tpu.memory_space<vmem>>, vector<1x192x20xbf16>
    %1 = vector.shape_cast %0 : vector<1x192x20xbf16> to vector<192x20xbf16>
    %c0_2 = arith.constant 0 : index
    %c0_3 = arith.constant 0 : index
    %2 = vector.load %arg3[%c0_2, %c0_3] : memref<20x128xbf16, #tpu.memory_space<vmem>>, vector<20x128xbf16>
    %cst = arith.constant dense<0.000000e+00> : vector<192x128xf32>
    %3 = tpu.matmul %1, %2, %cst {dimension_numbers = #tpu.dot_dimension_numbers<[1], [0], [0], [1], [0, 0, 1, 1], [], []>} : vector<192x20xbf16>, vector<20x128xbf16>, vector<192x128xf32> -> vector<192x128xf32>
    %cst_4 = arith.constant 0.000000e+00 : f32
    %4 = vector.broadcast %cst_4 : f32 to vector<192x128xf32>
    %5 = arith.maximumf %3, %4 : vector<192x128xf32>
    %6 = arith.truncf %5 : vector<192x128xf32> to vector<192x128xbf16>
    %c0_5 = arith.constant 0 : index
    %c0_6 = arith.constant 0 : index
    %7 = vector.load %arg4[%c0_5, %c0_6] : memref<128x128xbf16, #tpu.memory_space<vmem>>, vector<128x128xbf16>
    %cst_7 = arith.constant dense<0.000000e+00> : vector<192x128xf32>
    %8 = tpu.matmul %6, %7, %cst_7 {dimension_numbers = #tpu.dot_dimension_numbers<[1], [0], [0], [1], [0, 0, 1, 1], [], []>} : vector<192x128xbf16>, vector<128x128xbf16>, vector<192x128xf32> -> vector<192x128xf32>
    %c0_8 = arith.constant 0 : index
    %c0_9 = arith.constant 0 : index
    %9 = vector.load %arg5[%c0_8, %c0_9] : memref<1x128xf32, #tpu.memory_space<vmem>>, vector<1x128xf32>
    %10 = vector.broadcast %9 : vector<1x128xf32> to vector<192x128xf32>
    %11 = arith.addf %8, %10 : vector<192x128xf32>
    %cst_10 = arith.constant 0.000000e+00 : f32
    %12 = vector.broadcast %cst_10 : f32 to vector<192x128xf32>
    %13 = arith.maximumf %11, %12 : vector<192x128xf32>
    %14 = arith.truncf %13 : vector<192x128xf32> to vector<192x128xbf16>
    %c0_11 = arith.constant 0 : index
    %c0_12 = arith.constant 0 : index
    %15 = vector.load %arg6[%c0_11, %c0_12] : memref<128x128xbf16, #tpu.memory_space<vmem>>, vector<128x128xbf16>
    %cst_13 = arith.constant dense<0.000000e+00> : vector<192x128xf32>
    %16 = tpu.matmul %14, %15, %cst_13 {dimension_numbers = #tpu.dot_dimension_numbers<[1], [0], [0], [1], [0, 0, 1, 1], [], []>} : vector<192x128xbf16>, vector<128x128xbf16>, vector<192x128xf32> -> vector<192x128xf32>
    %c0_14 = arith.constant 0 : index
    %c0_15 = arith.constant 0 : index
    %17 = vector.load %arg7[%c0_14, %c0_15] : memref<1x128xf32, #tpu.memory_space<vmem>>, vector<1x128xf32>
    %18 = vector.broadcast %17 : vector<1x128xf32> to vector<192x128xf32>
    %19 = arith.addf %16, %18 : vector<192x128xf32>
    %c192_i32 = arith.constant 192 : i32
    %20 = arith.muli %arg1, %c192_i32 : i32
    %c192_i32_16 = arith.constant 192 : i32
    %21 = arith.subi %c192_i32_16, %20 : i32
    %22 = tpu.iota {dimensions = array<i32: 0>} : vector<192x1xi32>
    %23 = vector.broadcast %21 : i32 to vector<192x1xi32>
    %24 = arith.cmpi slt, %22, %23 : vector<192x1xi32>
    %cst_17 = arith.constant 0xFF800000 : f32
    %25 = vector.shape_cast %24 : vector<192x1xi1> to vector<192x1xi1>
    %26 = vector.broadcast %25 : vector<192x1xi1> to vector<192x128xi1>
    %27 = vector.broadcast %cst_17 : f32 to vector<192x128xf32>
    %28 = arith.select %26, %19, %27 : vector<192x128xi1>, vector<192x128xf32>
    %29 = vector.shape_cast %28 : vector<192x128xf32> to vector<24x8x128xf32>
    %cst_18 = arith.constant dense<0xFF800000> : vector<8x128xf32>
    %30 = vector.multi_reduction <maximumf>, %29, %cst_18 [0] : vector<24x8x128xf32> to vector<8x128xf32>
    %c0_i32 = arith.constant 0 : i32
    %31 = arith.cmpi eq, %arg1, %c0_i32 : i32
    %32 = arith.extui %31 : i1 to i32
    %c0_i32_19 = arith.constant 0 : i32
    %33 = arith.cmpi ne, %32, %c0_i32_19 : i32
    scf.if %33 {
      %cst_26 = arith.constant 0xFF800000 : f32
      %40 = vector.broadcast %cst_26 : f32 to vector<8x128xf32>
      %c0_27 = arith.constant 0 : index
      %c0_28 = arith.constant 0 : index
      %41 = vector.load %arg9[%c0_27, %c0_28] : memref<8x128xf32, #tpu.memory_space<vmem>>, vector<8x128xf32>
      tpu.vector_store %arg9[%c0_27, %c0_28], %40 {strides = array<i32>} : memref<8x128xf32, #tpu.memory_space<vmem>>, vector<8x128xf32>,
    } else {
    }
    %c0_20 = arith.constant 0 : index
    %c0_21 = arith.constant 0 : index
    %34 = vector.load %arg9[%c0_20, %c0_21] : memref<8x128xf32, #tpu.memory_space<vmem>>, vector<8x128xf32>
    %35 = arith.maximumf %34, %30 : vector<8x128xf32>
    %c0_22 = arith.constant 0 : index
    %c0_23 = arith.constant 0 : index
    %36 = vector.load %arg9[%c0_22, %c0_23] : memref<8x128xf32, #tpu.memory_space<vmem>>, vector<8x128xf32>
    tpu.vector_store %arg9[%c0_22, %c0_23], %35 {strides = array<i32>} : memref<8x128xf32, #tpu.memory_space<vmem>>, vector<8x128xf32>,
    %c0_i32_24 = arith.constant 0 : i32
    %37 = arith.cmpi eq, %arg1, %c0_i32_24 : i32
    %38 = arith.extui %37 : i1 to i32
    %c0_i32_25 = arith.constant 0 : i32
    %39 = arith.cmpi ne, %38, %c0_i32_25 : i32
    scf.if %39 {
      %c0_26 = arith.constant 0 : index
      %c0_27 = arith.constant 0 : index
      %40 = vector.load %arg9[%c0_26, %c0_27] : memref<8x128xf32, #tpu.memory_space<vmem>>, vector<8x128xf32>
      %cst_28 = arith.constant dense<0xFF800000> : vector<128xf32>
      %41 = vector.multi_reduction <maximumf>, %40, %cst_28 [0] : vector<8x128xf32> to vector<128xf32>
      %42 = vector.shape_cast %41 : vector<128xf32> to vector<1x128xf32>
      %c0_29 = arith.constant 0 : index
      %c0_30 = arith.constant 0 : index
      %c0_31 = arith.constant 0 : index
      %43 = vector.load %arg8[%c0_29, %c0_30, %c0_31] : memref<1x1x128xf32, #tpu.memory_space<vmem>>, vector<1x1x128xf32>
      %44 = vector.shape_cast %43 : vector<1x1x128xf32> to vector<1x128xf32>
      %45 = vector.shape_cast %42 : vector<1x128xf32> to vector<1x1x128xf32>
      tpu.vector_store %arg8[%c0_29, %c0_30, %c0_31], %45 {strides = array<i32>} : memref<1x1x128xf32, #tpu.memory_space<vmem>>, vector<1x1x128xf32>,
    } else {
    }
    return
  }
  func.func @transform_0(%arg0: i32, %arg1: i32) -> (i32, i32, i32) {
    %c0_i32 = arith.constant 0 : i32
    %c0_i32_0 = arith.constant 0 : i32
    return %arg0, %arg1, %c0_i32 : i32, i32, i32
  }
  func.func @transform_1(%arg0: i32, %arg1: i32) -> (i32, i32) {
    %c0_i32 = arith.constant 0 : i32
    %c0_i32_0 = arith.constant 0 : i32
    %c0_i32_1 = arith.constant 0 : i32
    return %c0_i32, %c0_i32_0 : i32, i32
  }
  func.func @transform_2(%arg0: i32, %arg1: i32) -> (i32, i32) {
    %c0_i32 = arith.constant 0 : i32
    %c0_i32_0 = arith.constant 0 : i32
    %c0_i32_1 = arith.constant 0 : i32
    return %c0_i32, %c0_i32_0 : i32, i32
  }
  func.func @transform_3(%arg0: i32, %arg1: i32) -> (i32, i32) {
    %c0_i32 = arith.constant 0 : i32
    %c0_i32_0 = arith.constant 0 : i32
    %c0_i32_1 = arith.constant 0 : i32
    return %c0_i32, %c0_i32_0 : i32, i32
  }
  func.func @transform_4(%arg0: i32, %arg1: i32) -> (i32, i32) {
    %c0_i32 = arith.constant 0 : i32
    %c0_i32_0 = arith.constant 0 : i32
    %c0_i32_1 = arith.constant 0 : i32
    return %c0_i32, %c0_i32_0 : i32, i32
  }
  func.func @transform_5(%arg0: i32, %arg1: i32) -> (i32, i32) {
    %c0_i32 = arith.constant 0 : i32
    %c0_i32_0 = arith.constant 0 : i32
    %c0_i32_1 = arith.constant 0 : i32
    return %c0_i32, %c0_i32_0 : i32, i32
  }
  func.func @transform_6(%arg0: i32, %arg1: i32) -> (i32, i32, i32) {
    %c0_i32 = arith.constant 0 : i32
    %c0_i32_0 = arith.constant 0 : i32
    %c0_i32_1 = arith.constant 0 : i32
    return %arg0, %c0_i32, %c0_i32_0 : i32, i32, i32
  }
}

</mosaic_0001>

<bundles_post_ra>
// kernel: tpu_custom_call.1
= control target key start
LH: loop header
LB: loop body
LE: loop exit
PB: predicated region body
PF: predicated region fallthrough
CT: control target
= control target key end

     0   :  { %11 = vsyncpa [#allocation4], 0  ;;  %s1911_s0 = inlined_call_operand.vmem [shape: bf16[2,192,20], index: 0, kind: input, shape index: {}]   ;;  %s1912_s1 = inlined_call_operand.vmem [shape: bf16[20,128], index: 1, kind: input, shape index: {}]   ;;  %s1913_s2 = inlined_call_operand.vmem [shape: bf16[128,128], index: 2, kind: input, shape index: {}]   ;;  %s1914_s3 = inlined_call_operand.vmem [shape: f32[1,128], index: 3, kind: input, shape index: {}]   ;;  %s1915_s4 = inlined_call_operand.vmem [shape: bf16[128,128], index: 4, kind: input, shape index: {}]   ;;  %s1916_s5 = inlined_call_operand.vmem [shape: f32[1,128], index: 5, kind: input, shape index: {}]   ;;  %s1917_s6 = inlined_call_operand.hbm [shape: f32[2,1,128], index: 6, kind: output, shape index: {}]  }
   0x1   :  { %13 = vsyncpa [#allocation4 + $0x1], 0  ;;  %s1687_s21 = smov 0   ;;  %s1689_s22 = smov 0  }
   0x2   :  { %s1691_s23 = smov 0   ;;  %s1693_s24 = smov 0  }
   0x3   :  { %s1695_s25 = smov 0   ;;  %s1697_s26 = smov 0  }
   0x4 LB: > { %s1264_s27 = sadd.s32 4294967295, %s1649_s26   ;;  %s1265_s28 = sadd.s32 4294967294, %s1649_s26   ;;  %s1649_s26 = sphi %s1697_s26, %s19_s26   ;;  %s1645_s25 = sphi %s1695_s25, %s1924_s25   ;;  %s1641_s24 = sphi %s1693_s24, %s1923_s24   ;;  %s1637_s23 = sphi %s1691_s23, %s1922_s23   ;;  %s1633_s22 = sphi %s1689_s22, %s1921_s22   ;;  %s1629_s21 = sphi %s1687_s21, %s1920_s21  }
   0x5   : > { %s31_s29 = sadd.s32 1, %s1645_s25  ;;  %s171_s30 = sadd.s32 1, %s1637_s23 }
   0x6   : > { %p33_p0 = scmp.ge.s32.totalorder %s31_s29, 2  ;;  %p181_p1 = scmp.ne.s32.totalorder %s1637_s23, %s1633_s22 }
   0x7   : > { %p182_p2 = scmp.eq.s32.totalorder %s1264_s27, 1  ;;  %p187_p3 = scmp.ne.s32.totalorder %s1633_s22, %s1629_s21 }
   0x8   : > { %s1926_s29 = smov (%p33_p0, %s31_s29), 0  ;;  %p188_p5 = scmp.eq.s32.totalorder %s1265_s28, 1 }
   0x9   : > { %p1727_p4 = por %p182_p2, %p181_p1  ;;  %s168_s8 = ssub.s32 %s1645_s25, %s1926_s29 }
   0xa   : > { %p1268_p6 = scmp.ge.s32.totalorder %s1649_s26, 1  ;;  %p169_p7 = scmp.eq.s32.totalorder %s168_s8, 0 }
   0xb   : > { %p1734_p8 = por %p188_p5, %p187_p3  ;;  %p234_p9 = scmp.lt.s32.totalorder %s1649_s26, 3 }
   0xc   : > { %s1740_s10 = scalar_select %p169_p7, %s1637_s23, %s171_s30  }
   0xd   : > { %p235_p10 = pnand %p1268_p6, %p234_p9 }
   0xe   : > { %v1541_v0 = vld [vmem:[%s1912_s1] sm:$0xff] (!%p235_p10)   ;;  %vm411_vm0 = vcmask (!%p235_p10), 1041408   ;;  %v1542_v1 = vld [vmem:[%s1912_s1 + $0x8] ss:$0 sps:$4 sm:$0x33] (!%p235_p10)   ;;  %p268_p11 = scmp.lt.s32.totalorder (!%p235_p10), %s1641_s24, 1 }
   0xf   : > { %238 = sbr.rel (%p235_p10) target bundleno = 760 (0x2f8), region = 44  ;;  %1371 = vmatprep.subr.bf16.mxu0 (!%p235_p10), %v1541_v0  ;;  %1479 = vmatprep.subr.bf16.mxu1 (!%p235_p10), %v1541_v0  ;;  %v413_v2 = vsel (!%p235_p10), %vm411_vm0, %v1542_v1, 0  ;;  %v1555_v3 = vld [vmem:[%s1913_s2] sm:$0xff] (!%p235_p10)   ;;  %vm374_vm1 = vcmask (!%p235_p10), 162816   ;;  %v1556_v10 = vld [vmem:[%s1913_s2 + $0x8] sm:$0xff] (!%p235_p10)   ;;  %v1557_v13 = vld [vmem:[%s1913_s2 + $0x10] sm:$0xff] (!%p235_p10)  }
  0x10   : > { %1372 = vmatpush3.bf16.msra.mxu0 (!%p235_p10), %v1541_v0  ;;  %1481 = vmatpush3.bf16.msra.mxu1 (!%p235_p10), %v1541_v0  ;;  %v1558_v17 = vld [vmem:[%s1913_s2 + $0x18] sm:$0xff] (!%p235_p10)   ;;  %v1559_v18 = vld [vmem:[%s1913_s2 + $0x20] sm:$0xff] (!%p235_p10)   ;;  %v1560_v20 = vld [vmem:[%s1913_s2 + $0x28] sm:$0xff] (!%p235_p10)   ;;  %s265_s14 = sand.u32 (!%p235_p10), 1, %s1633_s22  }
  0x11   : > { %1483 = vmatprep.subr.msk.bf16.mxu0 (!%p235_p10), %vm411_vm0, %v1542_v1  ;;  %1484 = vmatprep.subr.msk.bf16.mxu1 (!%p235_p10), %vm411_vm0, %v1542_v1  ;;  %v1561_v21 = vld [vmem:[%s1913_s2 + $0x30] sm:$0xff] (!%p235_p10)   ;;  %v1562_v22 = vld [vmem:[%s1913_s2 + $0x38] sm:$0xff] (!%p235_p10)   ;;  %v1563_v23 = vld [vmem:[%s1915_s4] sm:$0xff] (!%p235_p10)   ;;  %s266_s16 = scalar_lea.vmem (!%p235_p10), [#allocation3], %s265_s14  ;;  %s1183_s28 = scalar_lea.sflag (!%p235_p10), [#allocation4], %s265_s14 }
  0x12   : > { %v1564_v24 = vld [vmem:[%s1915_s4 + $0x8] sm:$0xff] (!%p235_p10)   ;;  %v1565_v25 = vld [vmem:[%s1915_s4 + $0x10] sm:$0xff] (!%p235_p10)   ;;  %v1566_v26 = vld [vmem:[%s1915_s4 + $0x18] sm:$0xff] (!%p235_p10)   ;;  %s1195_s17 = sshll.u32 (!%p235_p10), %s266_s16, 4  ;;  %s1866_s17 = int_to_ptr.vmem [resolvable:$true] %s1195_s17 }
  0x13   : > { %v1567_v27 = vld [vmem:[%s1915_s4 + $0x20] sm:$0xff] (!%p235_p10)   ;;  %v1568_v28 = vld [vmem:[%s1915_s4 + $0x28] sm:$0xff] (!%p235_p10)  }
  0x14   : > { %1374 = vmatpush3.bf16.msra.mxu0 (!%p235_p10), %v413_v2  ;;  %1482 = vmatpush3.bf16.msra.mxu1 (!%p235_p10), %v413_v2 }
  0x15   : > { %1399 = vmatprep.subr.bf16.mxu1 (!%p235_p10), %v1555_v3  ;;  %1439 = vmatprep.subr.bf16.mxu0 (!%p235_p10), %v1563_v23 }
  0x16   : > { %s269_s15 = scalar_select %p268_p11, %s1641_s24, 1 }
  0x18   : > { %s1485_s18 = smul.u32 96, %s269_s15  ;;  %s1314_s15 = sshll.u32 %s1641_s24, 4 }
  0x19   : > { %s1864_s20 = scalar_lea.hbm %s1917_s6, %s1314_s15  ;;  %s1651_s24 = smov [#allocation3]  }
  0x1a   : > { %s1756_s27 = scalar_lea.vmem %s1911_s0, %s1485_s18  ;;  %s1575_s30 = sshll.u32 %s1651_s24, 4  ;;  %s1576_s30 = int_to_ptr.vmem [resolvable:$false] %s1575_s30 }
  0x1b   : > { %v1543_v4 = vld [vmem:[%s1756_s27] sm:$0xff]   ;;  %v1544_v5 = vld [vmem:[%s1756_s27 + $0x8] sm:$0xff]   ;;  %v1545_v6 = vld [vmem:[%s1756_s27 + $0x10] sm:$0xff]   ;;  %s1577_s8 = scalar_lea.vmem %s1576_s30, 32  ;;  %p1578_p1 = scmp.lt.s32.totalorder %s1866_s17, %s1576_s30 }
  0x1c   : > { %1375 = vmatprep.mubr.msk.bf16.mxu0 %vm374_vm1, %v1543_v4  ;;  %v1546_v7 = vld [vmem:[%s1756_s27 + $0x18] sm:$0xff]   ;;  %v1547_v8 = vld [vmem:[%s1756_s27 + $0x20] sm:$0xff]   ;;  %v1552_v11 = vld [vmem:[%s1756_s27 + $0x48] sm:$0xff]  }
  0x1d   : > { %1376 = vmatmul.mubr.msk.bf16.vlgmr.msra.gmra.mrb[0].mxu0 %vm374_vm1, %v1544_v5  ;;  %v1551_v9 = vld [vmem:[%s1756_s27 + $0x40] sm:$0xff]   ;;  %v1553_v12 = vld [vmem:[%s1756_s27 + $0x50] sm:$0xff]   ;;  %v1548_v14 = vld [vmem:[%s1756_s27 + $0x28] sm:$0xff]  }
  0x1e   : > { %1379 = vmatprep.mubr.msk.bf16.mxu0 %vm374_vm1, %v1545_v6  ;;  %1391 = vmatprep.mubr.msk.bf16.mxu1 %vm374_vm1, %v1551_v9  ;;  %v1554_v15 = vld [vmem:[%s1756_s27 + $0x58] sm:$0xff]   ;;  %v1549_v16 = vld [vmem:[%s1756_s27 + $0x30] sm:$0xff]  }
  0x1f   : > { %1392 = vmatmul.mubr.msk.bf16.vlgmr.msra.gmra.mrb[0].mxu1 %vm374_vm1, %v1552_v11  ;;  %v1550_v19 = vld [vmem:[%s1756_s27 + $0x38] sm:$0xff]   ;;  %1440 = vmatpush3.bf16.msra.mxu0 %v1563_v23  ;;  %s1571_s27 = scalar_lea.vmem %s1866_s17, 16 }
  0x20   : > { %1395 = vmatprep.mubr.msk.bf16.mxu1 %vm374_vm1, %v1553_v12  ;;  %1400 = vmatpush3.bf16.msra.mxu1 %v1555_v3  ;;  %p1572_p12 = scmp.ne.s32.totalorder %s1866_s17, %s1571_s27  ;;  %p1579_p2 = scmp.lt.s32.totalorder %s1577_s8, %s1571_s27 }
  0x21   : > { %1401 = vmatprep.subr.bf16.mxu1 %v1556_v10  ;;  %1441 = vmatprep.subr.bf16.mxu0 %v1564_v24 }
  0x22   : > { %p1573_p13 = pnand %p1572_p12, %p1727_p4  ;;  %p1580_p3 = por %p1579_p2, %p1578_p1 }
  0x23   : > { %1442 = vmatpush3.bf16.msra.mxu0 %v1564_v24 }
  0x24   : > { %1402 = vmatpush3.bf16.msra.mxu1 %v1556_v10  ;;  %1443 = vmatprep.subr.bf16.mxu0 %v1565_v25  ;;  %p1574_p0 = pneg %p1573_p13 }
  0x25   : > { %1380 = vmatmul.mubr.msk.bf16.gmra.mrb[4].mxu0 %vm374_vm1, %v1546_v7  ;;  %1403 = vmatprep.subr.bf16.mxu1 %v1557_v13 }
  0x26   : > { %1383 = vmatprep.mubr.msk.bf16.mxu0 %vm374_vm1, %v1547_v8  ;;  %p1581_p5 = pnand %p1580_p3, %p1574_p0 }
  0x27   : > { %1396 = vmatmul.mubr.msk.bf16.gmra.mrb[4].mxu1 %vm374_vm1, %v1554_v15  ;;  %1444 = vmatpush3.bf16.msra.mxu0 %v1565_v25  ;;  %v1569_v25 = vld [vmem:[%s1915_s4 + $0x30] sm:$0xff]  }
  0x28   : > { %1404 = vmatpush3.bf16.msra.mxu1 %v1557_v13  ;;  %1445 = vmatprep.subr.bf16.mxu0 %v1566_v26 }
  0x29   : > { %1405 = vmatprep.subr.bf16.mxu1 %v1558_v17 }
  0x2b   : > { %1446 = vmatpush3.bf16.msra.mxu0 %v1566_v26  ;;  %v1570_v26 = vld [vmem:[%s1915_s4 + $0x38] sm:$0xff]  }
  0x2c   : > { %1406 = vmatpush3.bf16.msra.mxu1 %v1558_v17  ;;  %1447 = vmatprep.subr.bf16.mxu0 %v1567_v27 }
  0x2d   : > { %1384 = vmatmul.mubr.msk.bf16.gmra.mrb[8].mxu0 %vm374_vm1, %v1548_v14  ;;  %1407 = vmatprep.subr.bf16.mxu1 %v1559_v18 }
  0x2e   : > { %1387 = vmatprep.mubr.msk.bf16.mxu0 %vm374_vm1, %v1549_v16 }
  0x2f   : > { %1448 = vmatpush3.bf16.msra.mxu0 %v1567_v27  ;;  %v1830_v27 = vld [vmem:[%s1914_s3] ss:$0 sm:$0xff] }
  0x30   : > { %1408 = vmatpush3.bf16.msra.mxu1 %v1559_v18  ;;  %1449 = vmatprep.subr.bf16.mxu0 %v1568_v28 }
  0x31   : > { %1409 = vmatprep.subr.bf16.mxu1 %v1560_v20 }
  0x33   : > { %1450 = vmatpush3.bf16.msra.mxu0 %v1568_v28 }
  0x34   : > { %1410 = vmatpush3.bf16.msra.mxu1 %v1560_v20  ;;  %1451 = vmatprep.subr.bf16.mxu0 %v1569_v25 }
  0x35   : > { %1388 = vmatmul.mubr.msk.bf16.gmra.mrb[12].mxu0 %vm374_vm1, %v1550_v19  ;;  %1411 = vmatprep.subr.bf16.mxu1 %v1561_v21 }
  0x37   : > { %1452 = vmatpush3.bf16.msra.mxu0 %v1569_v25 }
  0x38   : > { %1412 = vmatpush3.bf16.msra.mxu1 %v1561_v21  ;;  %1453 = vmatprep.subr.bf16.mxu0 %v1570_v26 }
  0x39   : > { %1413 = vmatprep.subr.bf16.mxu1 %v1562_v22 }
  0x3b   : > { %1454 = vmatpush3.bf16.msra.mxu0 %v1570_v26 }
  0x3c   : > { %1414 = vmatpush3.bf16.msra.mxu1 %v1562_v22 }
  0xf0   : > { %v1377_v29 = vpop.f32.mrb[0].mxu0 }
  0xf1   : > { %v449_v30 = vpop.f32.mrb[1].mxu0  ;;  %v546_v32 = vmax.f32 %v1377_v29, 0.0 }
  0xf2   : > { %v1378_v31 = vpop.f32.mrb[2].mxu0  ;;  %v544_v35 = vmax.f32 %v449_v30, 0.0  ;;  %v1393_v40 = vpop.f32.mrb[0].mxu1 }
  0xf3   : > { %v547_v33 = vmax.f32 %v1378_v31, 0.0  ;;  %v452_v34 = vpop.f32.mrb[3].mxu0  ;;  %v562_v42 = vmax.f32 %v1393_v40, 0.0  ;;  %v513_v43 = vpop.f32.mrb[1].mxu1 }
  0xf4   : > { %v545_v36 = vmax.f32 %v452_v34, 0.0  ;;  %v560_v45 = vmax.f32 %v513_v43, 0.0  ;;  %v1394_v46 = vpop.f32.mrb[2].mxu1 }
  0xf5   : > { %v569_v37 = vpack.c.bf16 %v547_v33, %v546_v32  ;;  %v563_v50 = vmax.f32 %v1394_v46, 0.0  ;;  %v516_v51 = vpop.f32.mrb[3].mxu1 }
  0xf6   : > { %v568_v38 = vpack.c.bf16 %v545_v36, %v544_v35  ;;  %v561_v54 = vmax.f32 %v516_v51, 0.0 }
  0xf7   : > { %v577_v56 = vpack.c.bf16 %v563_v50, %v562_v42 }
  0xf8   : > { %v1381_v39 = vpop.f32.mrb[4].mxu0  ;;  %1415 = vmatprep.mubr.bf16.mxu1 %v568_v38  ;;  %v576_v58 = vpack.c.bf16 %v561_v54, %v560_v45 }
  0xf9   : > { %v465_v41 = vpop.f32.mrb[5].mxu0  ;;  %1416 = vmatmul.mubr.bf16.vlgmr.msra.gmra.mrb[8].mxu1 %v569_v37  ;;  %v550_v47 = vmax.f32 %v1381_v39, 0.0 }
  0xfa   : > { %v1382_v44 = vpop.f32.mrb[6].mxu0  ;;  %v548_v52 = vmax.f32 %v465_v41, 0.0  ;;  %v1397_v60 = vpop.f32.mrb[4].mxu1 }
  0xfb   : > { %v551_v48 = vmax.f32 %v1382_v44, 0.0  ;;  %v468_v49 = vpop.f32.mrb[7].mxu0  ;;  %v566_v62 = vmax.f32 %v1397_v60, 0.0  ;;  %v529_v63 = vpop.f32.mrb[5].mxu1 }
  0xfc   : > { %v549_v53 = vmax.f32 %v468_v49, 0.0  ;;  %v564_v1 = vmax.f32 %v529_v63, 0.0  ;;  %v1398_v2 = vpop.f32.mrb[6].mxu1 }
  0xfd   : > { %v571_v55 = vpack.c.bf16 %v551_v48, %v550_v47  ;;  %v567_v6 = vmax.f32 %v1398_v2, 0.0  ;;  %v532_v7 = vpop.f32.mrb[7].mxu1 }
  0xfe   : > { %v570_v57 = vpack.c.bf16 %v549_v53, %v548_v52  ;;  %v565_v10 = vmax.f32 %v532_v7, 0.0 }
  0xff   : > { %v579_v12 = vpack.c.bf16 %v567_v6, %v566_v62 }
 0x100   : > { %v1385_v59 = vpop.f32.mrb[8].mxu0  ;;  %1419 = vmatprep.mubr.bf16.mxu1 %v570_v57  ;;  %v578_v14 = vpack.c.bf16 %v565_v10, %v564_v1 }
 0x101   : > { %v481_v61 = vpop.f32.mrb[9].mxu0  ;;  %1420 = vmatmul.mubr.bf16.gmra.mrb[12].mxu1 %v571_v55  ;;  %v554_v3 = vmax.f32 %v1385_v59, 0.0 }
 0x102   : > { %v1386_v0 = vpop.f32.mrb[10].mxu0  ;;  %v552_v8 = vmax.f32 %v481_v61, 0.0 }
 0x103   : > { %v555_v4 = vmax.f32 %v1386_v0, 0.0  ;;  %v484_v5 = vpop.f32.mrb[11].mxu0 }
 0x104   : > { %v553_v9 = vmax.f32 %v484_v5, 0.0 }
 0x105   : > { %v573_v11 = vpack.c.bf16 %v555_v4, %v554_v3 }
 0x106   : > { %v572_v13 = vpack.c.bf16 %v553_v9, %v552_v8 }
 0x108   : > { %v1389_v15 = vpop.f32.mrb[12].mxu0  ;;  %1423 = vmatprep.mubr.bf16.mxu1 %v572_v13 }
 0x109   : > { %v497_v16 = vpop.f32.mrb[13].mxu0  ;;  %1424 = vmatmul.mubr.bf16.gmra.mrb[16].mxu1 %v573_v11  ;;  %v558_v18 = vmax.f32 %v1389_v15, 0.0 }
 0x10a   : > { %v1390_v17 = vpop.f32.mrb[14].mxu0  ;;  %v556_v21 = vmax.f32 %v497_v16, 0.0 }
 0x10b   : > { %v559_v19 = vmax.f32 %v1390_v17, 0.0  ;;  %v500_v20 = vpop.f32.mrb[15].mxu0 }
 0x10c   : > { %v557_v22 = vmax.f32 %v500_v20, 0.0 }
 0x10d   : > { %v575_v23 = vpack.c.bf16 %v559_v19, %v558_v18 }
 0x10e   : > { %v574_v24 = vpack.c.bf16 %v557_v22, %v556_v21 }
 0x110   : > { %1427 = vmatprep.mubr.bf16.mxu1 %v574_v24 }
 0x111   : > { %1428 = vmatmul.mubr.bf16.gmra.mrb[20].mxu1 %v575_v23 }
 0x112   : > { %1431 = vmatprep.mubr.bf16.mxu1 %v576_v58 }
 0x119   : > { %1432 = vmatmul.mubr.bf16.gmra.mrb[24].mxu1 %v577_v56 }
 0x11a   : > { %1435 = vmatprep.mubr.bf16.mxu1 %v578_v14 }
 0x121   : > { %1436 = vmatmul.mubr.bf16.gmra.mrb[28].mxu1 %v579_v12 }
 0x1cc   : > { %v1417_v28 = vpop.f32.mrb[8].mxu1 }
 0x1cd   : > { %v694_v29 = vadd.f32 %v1417_v28, %v1830_v27  ;;  %v685_v30 = vpop.f32.mrb[9].mxu1 }
 0x1ce   : > { %v686_v31 = vadd.f32 %v1830_v27, %v685_v30  ;;  %v1418_v32 = vpop.f32.mrb[10].mxu1 }
 0x1cf   : > { %v697_v33 = vadd.f32 %v1418_v32, %v1830_v27  ;;  %v688_v34 = vpop.f32.mrb[11].mxu1  ;;  %v782_v36 = vmax.f32 %v694_v29, 0.0 }
 0x1d0   : > { %v689_v35 = vadd.f32 %v1830_v27, %v688_v34  ;;  %v780_v38 = vmax.f32 %v686_v31, 0.0 }
 0x1d1   : > { %v783_v37 = vmax.f32 %v697_v33, 0.0 }
 0x1d2   : > { %v781_v39 = vmax.f32 %v689_v35, 0.0 }
 0x1d3   : > { %v805_v40 = vpack.c.bf16 %v783_v37, %v782_v36 }
 0x1d4   : > { %v804_v41 = vpack.c.bf16 %v781_v39, %v780_v38  ;;  %v1421_v42 = vpop.f32.mrb[12].mxu1 }
 0x1d5   : > { %v710_v43 = vadd.f32 %v1421_v42, %v1830_v27  ;;  %v701_v44 = vpop.f32.mrb[13].mxu1 }
 0x1d6   : > { %v702_v45 = vadd.f32 %v1830_v27, %v701_v44  ;;  %v1422_v46 = vpop.f32.mrb[14].mxu1  ;;  %1455 = vmatprep.mubr.bf16.mxu0 %v804_v41 }
 0x1d7   : > { %v713_v47 = vadd.f32 %v1422_v46, %v1830_v27  ;;  %v704_v48 = vpop.f32.mrb[15].mxu1  ;;  %1456 = vmatmul.mubr.bf16.vlgmr.msra.gmra.mrb[16].mxu0 %v805_v40  ;;  %v786_v50 = vmax.f32 %v710_v43, 0.0 }
 0x1d8   : > { %v705_v49 = vadd.f32 %v1830_v27, %v704_v48  ;;  %v784_v52 = vmax.f32 %v702_v45, 0.0 }
 0x1d9   : > { %v787_v51 = vmax.f32 %v713_v47, 0.0 }
 0x1da   : > { %v785_v53 = vmax.f32 %v705_v49, 0.0 }
 0x1db   : > { %v807_v54 = vpack.c.bf16 %v787_v51, %v786_v50 }
 0x1dc   : > { %v806_v55 = vpack.c.bf16 %v785_v53, %v784_v52  ;;  %v1425_v56 = vpop.f32.mrb[16].mxu1  ;;  %v1305_v53 = vld [vmem:[%s1916_s5] ss:$0 sm:$0xff] }
 0x1dd   : > { %v726_v57 = vadd.f32 %v1425_v56, %v1830_v27  ;;  %v717_v58 = vpop.f32.mrb[17].mxu1 }
 0x1de   : > { %v718_v59 = vadd.f32 %v1830_v27, %v717_v58  ;;  %v1426_v60 = vpop.f32.mrb[18].mxu1  ;;  %1459 = vmatprep.mubr.bf16.mxu0 %v806_v55 }
 0x1df   : > { %v729_v61 = vadd.f32 %v1426_v60, %v1830_v27  ;;  %v720_v62 = vpop.f32.mrb[19].mxu1  ;;  %1460 = vmatmul.mubr.bf16.gmra.mrb[20].mxu0 %v807_v54  ;;  %v790_v0 = vmax.f32 %v726_v57, 0.0 }
 0x1e0   : > { %v721_v63 = vadd.f32 %v1830_v27, %v720_v62  ;;  %v788_v2 = vmax.f32 %v718_v59, 0.0 }
 0x1e1   : > { %v791_v1 = vmax.f32 %v729_v61, 0.0 }
 0x1e2   : > { %v789_v3 = vmax.f32 %v721_v63, 0.0 }
 0x1e3   : > { %v809_v4 = vpack.c.bf16 %v791_v1, %v790_v0 }
 0x1e4   : > { %v808_v5 = vpack.c.bf16 %v789_v3, %v788_v2  ;;  %v1429_v6 = vpop.f32.mrb[20].mxu1 }
 0x1e5   : > { %v742_v7 = vadd.f32 %v1429_v6, %v1830_v27  ;;  %v733_v8 = vpop.f32.mrb[21].mxu1 }
 0x1e6   : > { %v734_v9 = vadd.f32 %v1830_v27, %v733_v8  ;;  %v1430_v10 = vpop.f32.mrb[22].mxu1  ;;  %1463 = vmatprep.mubr.bf16.mxu0 %v808_v5 }
 0x1e7   : > { %v745_v11 = vadd.f32 %v1430_v10, %v1830_v27  ;;  %v736_v12 = vpop.f32.mrb[23].mxu1  ;;  %1464 = vmatmul.mubr.bf16.gmra.mrb[24].mxu0 %v809_v4  ;;  %v794_v14 = vmax.f32 %v742_v7, 0.0 }
 0x1e8   : > { %v737_v13 = vadd.f32 %v1830_v27, %v736_v12  ;;  %v792_v16 = vmax.f32 %v734_v9, 0.0 }
 0x1e9   : > { %v795_v15 = vmax.f32 %v745_v11, 0.0 }
 0x1ea   : > { %v793_v17 = vmax.f32 %v737_v13, 0.0 }
 0x1eb   : > { %v811_v18 = vpack.c.bf16 %v795_v15, %v794_v14 }
 0x1ec   : > { %v810_v19 = vpack.c.bf16 %v793_v17, %v792_v16  ;;  %v1433_v20 = vpop.f32.mrb[24].mxu1 }
 0x1ed   : > { %v758_v21 = vadd.f32 %v1433_v20, %v1830_v27  ;;  %v749_v22 = vpop.f32.mrb[25].mxu1 }
 0x1ee   : > { %v750_v23 = vadd.f32 %v1830_v27, %v749_v22  ;;  %v1434_v24 = vpop.f32.mrb[26].mxu1  ;;  %1467 = vmatprep.mubr.bf16.mxu0 %v810_v19 }
 0x1ef   : > { %v761_v25 = vadd.f32 %v1434_v24, %v1830_v27  ;;  %v752_v26 = vpop.f32.mrb[27].mxu1  ;;  %1468 = vmatmul.mubr.bf16.gmra.mrb[28].mxu0 %v811_v18  ;;  %v798_v29 = vmax.f32 %v758_v21, 0.0 }
 0x1f0   : > { %v753_v28 = vadd.f32 %v1830_v27, %v752_v26  ;;  %v796_v31 = vmax.f32 %v750_v23, 0.0 }
 0x1f1   : > { %v799_v30 = vmax.f32 %v761_v25, 0.0 }
 0x1f2   : > { %v797_v32 = vmax.f32 %v753_v28, 0.0 }
 0x1f3   : > { %v813_v33 = vpack.c.bf16 %v799_v30, %v798_v29 }
 0x1f4   : > { %v812_v34 = vpack.c.bf16 %v797_v32, %v796_v31  ;;  %v1437_v35 = vpop.f32.mrb[28].mxu1 }
 0x1f5   : > { %v774_v36 = vadd.f32 %v1437_v35, %v1830_v27  ;;  %v765_v37 = vpop.f32.mrb[29].mxu1 }
 0x1f6   : > { %v766_v38 = vadd.f32 %v1830_v27, %v765_v37  ;;  %v1438_v39 = vpop.f32.mrb[30].mxu1  ;;  %1471 = vmatprep.mubr.bf16.mxu0 %v812_v34 }
 0x1f7   : > { %v777_v40 = vadd.f32 %v1438_v39, %v1830_v27  ;;  %v768_v41 = vpop.f32.mrb[31].mxu1  ;;  %1472 = vmatmul.mubr.bf16.gmra.mrb[32].mxu0 %v813_v33  ;;  %v802_v43 = vmax.f32 %v774_v36, 0.0 }
 0x1f8   : > { %v769_v42 = vadd.f32 %v1830_v27, %v768_v41  ;;  %v800_v45 = vmax.f32 %v766_v38, 0.0 }
 0x1f9   : > { %v803_v44 = vmax.f32 %v777_v40, 0.0 }
 0x1fa   : > { %v801_v46 = vmax.f32 %v769_v42, 0.0 }
 0x1fb   : > { %v815_v47 = vpack.c.bf16 %v803_v44, %v802_v43 }
 0x1fc   : > { %v814_v48 = vpack.c.bf16 %v801_v46, %v800_v45 }
 0x1fe   : > { %1475 = vmatprep.mubr.bf16.mxu0 %v814_v48 }
 0x1ff   : > { %1476 = vmatmul.mubr.bf16.gmra.mrb[36].mxu0 %v815_v47 }
 0x2aa   : > { %v1457_v49 = vpop.f32.mrb[16].mxu0 }
 0x2ab   : > { %v921_v50 = vpop.f32.mrb[17].mxu0  ;;  %v930_v55 = vadd.f32 %v1457_v49, %v1305_v53 }
 0x2ac   : > { %v1458_v51 = vpop.f32.mrb[18].mxu0  ;;  %v922_v57 = vadd.f32 %v1305_v53, %v921_v50 }
 0x2ad   : > { %v924_v52 = vpop.f32.mrb[19].mxu0  ;;  %v933_v60 = vadd.f32 %v1458_v51, %v1305_v53 }
 0x2ae   : > { %v925_v0 = vadd.f32 %v1305_v53, %v924_v52 }
 0x2b2   : > { %v1461_v54 = vpop.f32.mrb[20].mxu0 }
 0x2b3   : > { %v946_v56 = vadd.f32 %v1461_v54, %v1305_v53  ;;  %v937_v27 = vpop.f32.mrb[21].mxu0 }
 0x2b4   : > { %v938_v58 = vadd.f32 %v1305_v53, %v937_v27  ;;  %v1462_v59 = vpop.f32.mrb[22].mxu0 }
 0x2b5   : > { %v1142_v61 = vmax.f32 %v930_v55, %v946_v56  ;;  %v949_v62 = vadd.f32 %v1462_v59, %v1305_v53  ;;  %v940_v63 = vpop.f32.mrb[23].mxu0 }
 0x2b6   : > { %v1140_v1 = vmax.f32 %v922_v57, %v938_v58  ;;  %v941_v2 = vadd.f32 %v1305_v53, %v940_v63 }
 0x2b7   : > { %v1143_v3 = vmax.f32 %v933_v60, %v949_v62 }
 0x2b8   : > { %v1141_v4 = vmax.f32 %v925_v0, %v941_v2 }
 0x2ba   : > { %v1465_v5 = vpop.f32.mrb[24].mxu0 }
 0x2bb   : > { %v962_v6 = vadd.f32 %v1465_v5, %v1305_v53  ;;  %v953_v7 = vpop.f32.mrb[25].mxu0 }
 0x2bc   : > { %v954_v8 = vadd.f32 %v1305_v53, %v953_v7  ;;  %v1466_v9 = vpop.f32.mrb[26].mxu0 }
 0x2bd   : > { %v1146_v10 = vmax.f32 %v1142_v61, %v962_v6  ;;  %v965_v11 = vadd.f32 %v1466_v9, %v1305_v53  ;;  %v956_v12 = vpop.f32.mrb[27].mxu0 }
 0x2be   : > { %v1144_v13 = vmax.f32 %v1140_v1, %v954_v8  ;;  %v957_v14 = vadd.f32 %v1305_v53, %v956_v12 }
 0x2bf   : > { %v1147_v15 = vmax.f32 %v1143_v3, %v965_v11 }
 0x2c0   : > { %v1145_v16 = vmax.f32 %v1141_v4, %v957_v14 }
 0x2c2   : > { %v1469_v17 = vpop.f32.mrb[28].mxu0 }
 0x2c3   : > { %v978_v18 = vadd.f32 %v1469_v17, %v1305_v53  ;;  %v969_v19 = vpop.f32.mrb[29].mxu0 }
 0x2c4   : > { %v970_v20 = vadd.f32 %v1305_v53, %v969_v19  ;;  %v1470_v21 = vpop.f32.mrb[30].mxu0 }
 0x2c5   : > { %v1150_v22 = vmax.f32 %v1146_v10, %v978_v18  ;;  %v981_v23 = vadd.f32 %v1470_v21, %v1305_v53  ;;  %v972_v24 = vpop.f32.mrb[31].mxu0 }
 0x2c6   : > { %v1148_v25 = vmax.f32 %v1144_v13, %v970_v20  ;;  %v973_v26 = vadd.f32 %v1305_v53, %v972_v24 }
 0x2c7   : > { %v1151_v28 = vmax.f32 %v1147_v15, %v981_v23 }
 0x2c8   : > { %v1149_v29 = vmax.f32 %v1145_v16, %v973_v26 }
 0x2ca   : > { %v1473_v30 = vpop.f32.mrb[32].mxu0 }
 0x2cb   : > { %v994_v31 = vadd.f32 %v1473_v30, %v1305_v53  ;;  %v985_v32 = vpop.f32.mrb[33].mxu0 }
 0x2cc   : > { %v986_v33 = vadd.f32 %v1305_v53, %v985_v32  ;;  %v1474_v34 = vpop.f32.mrb[34].mxu0 }
 0x2cd   : > { %v1154_v35 = vmax.f32 %v1150_v22, %v994_v31  ;;  %v997_v36 = vadd.f32 %v1474_v34, %v1305_v53  ;;  %v988_v37 = vpop.f32.mrb[35].mxu0 }
 0x2ce   : > { %v1152_v38 = vmax.f32 %v1148_v25, %v986_v33  ;;  %v989_v39 = vadd.f32 %v1305_v53, %v988_v37 }
 0x2cf   : > { %v1155_v40 = vmax.f32 %v1151_v28, %v997_v36 }
 0x2d0   : > { %v1153_v41 = vmax.f32 %v1149_v29, %v989_v39 }
 0x2d2   : > { %v1477_v42 = vpop.f32.mrb[36].mxu0 }
 0x2d3   : > { %v1010_v43 = vadd.f32 %v1477_v42, %v1305_v53  ;;  %v1001_v44 = vpop.f32.mrb[37].mxu0 }
 0x2d4   : > { %v1002_v45 = vadd.f32 %v1305_v53, %v1001_v44  ;;  %v1478_v46 = vpop.f32.mrb[38].mxu0 }
 0x2d5   : > { %v1158_v47 = vmax.f32 %v1154_v35, %v1010_v43  ;;  %v1013_v48 = vadd.f32 %v1478_v46, %v1305_v53  ;;  %v1004_v49 = vpop.f32.mrb[39].mxu0 }
 0x2d6   : > { %v1156_v50 = vmax.f32 %v1152_v38, %v1002_v45  ;;  %v1005_v51 = vadd.f32 %v1305_v53, %v1004_v49 }
 0x2d7   : > { %v1159_v52 = vmax.f32 %v1155_v40, %v1013_v48 }
 0x2d8   : > { %v1157_v54 = vmax.f32 %v1153_v41, %v1005_v51 }
 0x2d9   : > { %v1161_v55 = vmax.f32 %v1158_v47, %v1159_v52 }
 0x2da   : > { %v1160_v56 = vmax.f32 %v1156_v50, %v1157_v54 }
 0x2dc   : > { %v1162_v27 = vmax.f32 %v1160_v56, %v1161_v55 }
 0x2de   : > { %v1175_v57 = vrot.slane %v1162_v27, 4 }
 0x2e0   : > { %v1176_v58 = vmax.f32 %v1162_v27, %v1175_v57 }
 0x2e2   : > { %v1177_v59 = vrot.slane %v1176_v58, 2 }
 0x2e4   : > { %v1178_v60 = vmax.f32 %v1176_v58, %v1177_v59 }
 0x2e6   : > { %v1179_v61 = vrot.slane %v1178_v60, 1 }
 0x2e8   : > { %v1180_v62 = vmax.f32 %v1178_v60, %v1179_v61 }
 0x2ea   : > { %1181 = vst [vmem:[%s266_s16] sm:$0x1] %v1180_v62 }
 0x2eb   : > { %1584 = shalt.err (!%p1581_p5)
}
 0x2ec   : > { %s1585_s11 = scalar_lea.hbm %s1864_s20, 16  ;;  %s1589_s14 = scalar_lea.hbm %s1917_s6, 32 }
 0x2ed   : > { %p1586_p6 = scmp.ne.s32.totalorder %s1864_s20, %s1585_s11  ;;  %p1590_p10 = scmp.lt.u32.totalorder %s1864_s20, %s1917_s6 }
 0x2ee   : > { %p1591_p11 = scmp.lt.u32.totalorder %s1589_s14, %s1585_s11  ;;  %p1593_p13 = scmp.lt.u32.totalorder %s1585_s11, %s1864_s20 }
 0x2ef   : > { %p1587_p7 = pnand %p1586_p6, %p1727_p4 }
 0x2f0   : > { %p1592_p12 = por %p1591_p11, %p1590_p10 }
 0x2f1   : > { %p1588_p9 = pneg %p1587_p7 }
 0x2f2   : > { %p1594_p0 = por %p1593_p13, %p1592_p12 }
 0x2f4   : > { %p1595_p1 = pnand %p1594_p0, %p1588_p9 }
 0x2f6   : > { %1598 = shalt.err (!%p1595_p1)
}
 0x2f7   : > { %1486 = dma.vmem_to_hbm [thread:$0]  (%p1727_p4), %s1866_s17, 16, %s1864_s20, %s1183_s28  }
 0x2f8 PF: > { %p1492_p2 = scmp.ge.s32.totalorder %s1649_s26, 2  ;;  %s1207_s18 = sand.u32 1, %s1629_s21  }
 0x2f9   : > { %s1208_s19 = scalar_lea.sflag [#allocation4], %s1207_s18 }
 0x2fa   : > { %p1489_p3 = pnand %p1492_p2, %p1734_p8 }
 0x2fc   : > { %1624 = dma.done.wait (!%p1489_p3), %s1208_s19, 16  }
 0x2fd   : > { %1626 = vsyncadd (!%p1489_p3), %s1208_s19, 4294967280  ;;  %s19_s26 = sadd.s32 1, %s1649_s26   ;;  %s1920_s21 = smov %s1633_s22 }
 0x2fe   : > { %p16_p5 = scmp.ge.s32.totalorder %s19_s26, 4   ;;  %s1921_s22 = smov %s1637_s23 }
 0x2ff   : > { %s1922_s23 = smov %s1740_s10  ;;  %s1923_s24 = smov %s1645_s25 }
 0x300   : > { %s1924_s25 = smov %s1926_s29  ;;  %18 = sbr.rel (!%p16_p5) target bundleno = 4 (0x4), region = 87 }
 0x307   :  { %1212 = vsyncpa [#allocation4], 1 }
 0x308   :  { %1214 = vsyncpa [#allocation4 + $0x1], 1 }

</bundles_post_ra>
